<compile_context>
chip_gen: v6e
topology: v6e:2x2x1
jax: 0.10.0
libtpu: 0.0.40
codegen_flags: <defaults>
</compile_context>

<pallas_src>
import functools

import jax
import jax.numpy as jnp
from jax.experimental import pallas as pl
from jax.experimental.pallas import tpu as pltpu


def _mlp_kernel(x_ref, w1_ref, b1_ref, w2_ref, b2_ref, w3_ref, b3_ref, o_ref):
    """One batch tile of the 3-layer MLP.

    x_ref : (bb, Fp) bf16    w1_ref: (Fp, H) bf16    b1_ref: (1, H) f32
    w2_ref: (H, H)   bf16    b2_ref: (1, H)  f32
    w3_ref: (1, H)   bf16    b3_ref: (1, 1)  f32
    o_ref : (1, bb)  f32     (batch along lanes -> dense, unmasked stores)
    """
    # layer1 + ReLU: bf16 MXU matmul, f32 accumulate, f32 bias/ReLU.
    h = jnp.dot(x_ref[...], w1_ref[...], preferred_element_type=jnp.float32)
    h = jnp.maximum(h + b1_ref[...], 0.0)
    # layer2 + ReLU.
    h = jnp.dot(h.astype(jnp.bfloat16), w2_ref[...],
                preferred_element_type=jnp.float32)
    h = jnp.maximum(h + b2_ref[...], 0.0)
    # layer3 head (out dim = 1): a (bb,256)@(256,1) MXU matmul would waste
    # >99% of the systolic array, so use VPU multiply + XLU lane reduction
    # (both units are idle while the two real matmuls own the MXU slot).
    y = jnp.sum(h * w3_ref[...].astype(jnp.float32), axis=-1)        # (bb,)
    o_ref[...] = (y[None, :] + b3_ref[...]).astype(o_ref.dtype)      # (1, bb)


@functools.partial(jax.jit, static_argnames=("block_b",))
def net_forward(x, params, block_b=512):
    """x: (B, nfeatures) f32 -> (B, 1) f32."""
    w1, b1, w2, b2, w3, b3 = params
    B, F = x.shape
    H = w1.shape[1]          # 256

    # Zero-pad the feature dim to a multiple of 128: fills the MXU K depth and
    # makes the x tile lane-dense; padded zeros contribute nothing (exact).
    Fp = pl.cdiv(F, 128) * 128
    if Fp != F:
        x = jnp.pad(x, ((0, 0), (0, Fp - F)))
        w1 = jnp.pad(w1, ((0, Fp - F), (0, 0)))

    # bf16 matmul operands; accumulation, biases and ReLU stay in f32.
    x_bf = x.astype(jnp.bfloat16)
    w1_bf = w1.astype(jnp.bfloat16)
    w2_bf = w2.astype(jnp.bfloat16)
    w3_row = w3.reshape(1, H).astype(jnp.bfloat16)    # (1, H) row for VPU head
    b3_2d = b3.reshape(1, 1)

    bb = min(block_b, B)
    grid = (pl.cdiv(B, bb),)

    # VMEM budget per step (block_b up to ~2048): bf16 x tile (x2 buffers),
    # resident weights (~320 KB, constant index_map -> DMA'd once) and f32
    # (bb,256) intermediates stay well under the 16 MiB v5e scoped default,
    # so no vmem_limit_bytes override is required on any generation.
    y_row = pl.pallas_call(
        _mlp_kernel,
        out_shape=jax.ShapeDtypeStruct((1, B), jnp.float32),
        grid_spec=pltpu.PrefetchScalarGridSpec(
            num_scalar_prefetch=0,
            grid=grid,
            in_specs=[
                pl.BlockSpec((bb, Fp), lambda i: (i, 0)),   # x tile over batch
                pl.BlockSpec((Fp, H), lambda i: (0, 0)),    # w1 (resident)
                pl.BlockSpec((1, H), lambda i: (0, 0)),     # b1
                pl.BlockSpec((H, H), lambda i: (0, 0)),     # w2
                pl.BlockSpec((1, H), lambda i: (0, 0)),     # b2
                pl.BlockSpec((1, H), lambda i: (0, 0)),     # w3 as a row
                pl.BlockSpec((1, 1), lambda i: (0, 0)),     # b3
            ],
            # lane-dense output: batch along lanes -> unmasked vector stores
            out_specs=pl.BlockSpec((1, bb), lambda i: (0, i)),
        ),
        compiler_params=pltpu.CompilerParams(
            dimension_semantics=("parallel",)),   # megacore / v7x 2-TC split
    )(x_bf, w1_bf, b1, w2_bf, b2, w3_row, b3_2d)

    return y_row.reshape(B, 1)


def init_params(key, nfeatures, hidden=256, out=1):
    """Deterministic PyTorch-style init: U(-1/sqrt(fan_in), 1/sqrt(fan_in))."""
    def linear(k, fan_in, fan_out):
        kw, kb = jax.random.split(k)
        bound = 1.0 / (fan_in ** 0.5)
        w = jax.random.uniform(kw, (fan_in, fan_out), jnp.float32, -bound, bound)
        b = jax.random.uniform(kb, (1, fan_out), jnp.float32, -bound, bound)
        return w, b

    k1, k2, k3 = jax.random.split(key, 3)
    w1, b1 = linear(k1, nfeatures, hidden)
    w2, b2 = linear(k2, hidden, hidden)
    w3, b3 = linear(k3, hidden, out)
    return (w1, b1, w2, b2, w3, b3)


def _reference(x, params):
    """Plain-JAX reference using the same bf16-operand / f32-accumulate math."""
    w1, b1, w2, b2, w3, b3 = params
    h = jnp.dot(x.astype(jnp.bfloat16), w1.astype(jnp.bfloat16),
                preferred_element_type=jnp.float32)
    h = jnp.maximum(h + b1, 0.0)
    h = jnp.dot(h.astype(jnp.bfloat16), w2.astype(jnp.bfloat16),
                preferred_element_type=jnp.float32)
    h = jnp.maximum(h + b2, 0.0)
    w3_row = w3.reshape(1, -1).astype(jnp.bfloat16).astype(jnp.float32)
    return jnp.sum(h * w3_row, axis=-1, keepdims=True) + b3


if __name__ == "__main__":
    key = jax.random.PRNGKey(0)
    kx, kp, kx2 = jax.random.split(key, 3)

    batch, nfeatures = 8, 32
    x = jax.random.normal(kx, (batch, nfeatures), jnp.float32)
    params = init_params(kp, nfeatures)

    y = net_forward(x, params)
    jax.block_until_ready(y)
    y_ref = _reference(x, params)
    assert y.shape == (batch, 1)
    assert jnp.allclose(y, y_ref, atol=1e-2, rtol=1e-2)

    # second check: multi-tile grid with a ragged final batch tile
    batch2 = 1000
    x2 = jax.random.normal(kx2, (batch2, nfeatures), jnp.float32)
    y2 = net_forward(x2, params)
    jax.block_until_ready(y2)
    y2_ref = _reference(x2, params)
    assert y2.shape == (batch2, 1)
    assert jnp.allclose(y2, y2_ref, atol=1e-2, rtol=1e-2)

    print("KERNEL_OK")
</pallas_src>

<mosaic_0001>
module attributes {stable_mosaic.version = 11 : i64} {
  func.func @_mlp_kernel(%arg0: i32, %arg1: memref<8x128xbf16, #tpu.memory_space<vmem>>, %arg2: memref<128x256xbf16, #tpu.memory_space<vmem>>, %arg3: memref<1x256xf32, #tpu.memory_space<vmem>>, %arg4: memref<256x256xbf16, #tpu.memory_space<vmem>>, %arg5: memref<1x256xf32, #tpu.memory_space<vmem>>, %arg6: memref<1x256xbf16, #tpu.memory_space<vmem>>, %arg7: memref<1x1xf32, #tpu.memory_space<vmem>>, %arg8: memref<1x8xf32, #tpu.memory_space<vmem>>) attributes {dimension_semantics = [#tpu.dimension_semantics<parallel>], iteration_bounds = array<i64: 1>, scalar_prefetch = 0 : i64, scratch_operands = 0 : i64, tpu.core_type = #tpu.core_type<tc>, window_params = [{transform_indices = @transform_0, window_bounds = array<i64: 8, 128>}, {pipeline_mode = #tpu.pipeline_mode<synchronous>, transform_indices = @transform_1, window_bounds = array<i64: 128, 256>}, {pipeline_mode = #tpu.pipeline_mode<synchronous>, transform_indices = @transform_2, window_bounds = array<i64: 1, 256>}, {pipeline_mode = #tpu.pipeline_mode<synchronous>, transform_indices = @transform_3, window_bounds = array<i64: 256, 256>}, {pipeline_mode = #tpu.pipeline_mode<synchronous>, transform_indices = @transform_4, window_bounds = array<i64: 1, 256>}, {pipeline_mode = #tpu.pipeline_mode<synchronous>, transform_indices = @transform_5, window_bounds = array<i64: 1, 256>}, {pipeline_mode = #tpu.pipeline_mode<synchronous>, transform_indices = @transform_6, window_bounds = array<i64: 1, 1>}, {transform_indices = @transform_7, window_bounds = array<i64: 1, 8>}]} {
    %c0 = arith.constant 0 : index
    %c0_0 = arith.constant 0 : index
    %0 = vector.load %arg1[%c0, %c0_0] : memref<8x128xbf16, #tpu.memory_space<vmem>>, vector<8x128xbf16>
    %c0_1 = arith.constant 0 : index
    %c0_2 = arith.constant 0 : index
    %1 = vector.load %arg2[%c0_1, %c0_2] : memref<128x256xbf16, #tpu.memory_space<vmem>>, vector<128x256xbf16>
    %cst = arith.constant dense<0.000000e+00> : vector<8x256xf32>
    %2 = tpu.matmul %0, %1, %cst {dimension_numbers = #tpu.dot_dimension_numbers<[1], [0], [0], [1], [0, 0, 1, 1], [], []>} : vector<8x128xbf16>, vector<128x256xbf16>, vector<8x256xf32> -> vector<8x256xf32>
    %c0_3 = arith.constant 0 : index
    %c0_4 = arith.constant 0 : index
    %3 = vector.load %arg3[%c0_3, %c0_4] : memref<1x256xf32, #tpu.memory_space<vmem>>, vector<1x256xf32>
    %4 = vector.broadcast %3 : vector<1x256xf32> to vector<8x256xf32>
    %5 = arith.addf %2, %4 : vector<8x256xf32>
    %cst_5 = arith.constant 0.000000e+00 : f32
    %6 = vector.broadcast %cst_5 : f32 to vector<8x256xf32>
    %7 = arith.maximumf %5, %6 : vector<8x256xf32>
    %8 = arith.truncf %7 : vector<8x256xf32> to vector<8x256xbf16>
    %c0_6 = arith.constant 0 : index
    %c0_7 = arith.constant 0 : index
    %9 = vector.load %arg4[%c0_6, %c0_7] : memref<256x256xbf16, #tpu.memory_space<vmem>>, vector<256x256xbf16>
    %cst_8 = arith.constant dense<0.000000e+00> : vector<8x256xf32>
    %10 = tpu.matmul %8, %9, %cst_8 {dimension_numbers = #tpu.dot_dimension_numbers<[1], [0], [0], [1], [0, 0, 1, 1], [], []>} : vector<8x256xbf16>, vector<256x256xbf16>, vector<8x256xf32> -> vector<8x256xf32>
    %c0_9 = arith.constant 0 : index
    %c0_10 = arith.constant 0 : index
    %11 = vector.load %arg5[%c0_9, %c0_10] : memref<1x256xf32, #tpu.memory_space<vmem>>, vector<1x256xf32>
    %12 = vector.broadcast %11 : vector<1x256xf32> to vector<8x256xf32>
    %13 = arith.addf %10, %12 : vector<8x256xf32>
    %cst_11 = arith.constant 0.000000e+00 : f32
    %14 = vector.broadcast %cst_11 : f32 to vector<8x256xf32>
    %15 = arith.maximumf %13, %14 : vector<8x256xf32>
    %c0_12 = arith.constant 0 : index
    %c0_13 = arith.constant 0 : index
    %16 = vector.load %arg6[%c0_12, %c0_13] : memref<1x256xbf16, #tpu.memory_space<vmem>>, vector<1x256xbf16>
    %17 = arith.extf %16 : vector<1x256xbf16> to vector<1x256xf32>
    %18 = vector.broadcast %17 : vector<1x256xf32> to vector<8x256xf32>
    %19 = arith.mulf %15, %18 : vector<8x256xf32>
    %cst_14 = arith.constant dense<0.000000e+00> : vector<8xf32>
    %20 = vector.multi_reduction <add>, %19, %cst_14 [1] : vector<8x256xf32> to vector<8xf32>
    %21 = vector.shape_cast %20 : vector<8xf32> to vector<1x8xf32>
    %c0_15 = arith.constant 0 : index
    %c0_16 = arith.constant 0 : index
    %22 = vector.load %arg7[%c0_15, %c0_16] : memref<1x1xf32, #tpu.memory_space<vmem>>, vector<1x1xf32>
    %23 = vector.broadcast %22 : vector<1x1xf32> to vector<1x8xf32>
    %24 = arith.addf %21, %23 : vector<1x8xf32>
    %c0_17 = arith.constant 0 : index
    %c0_18 = arith.constant 0 : index
    %25 = vector.load %arg8[%c0_17, %c0_18] : memref<1x8xf32, #tpu.memory_space<vmem>>, vector<1x8xf32>
    tpu.vector_store %arg8[%c0_17, %c0_18], %24 {strides = array<i32>} : memref<1x8xf32, #tpu.memory_space<vmem>>, vector<1x8xf32>,
    return
  }
  func.func @transform_0(%arg0: i32) -> (i32, i32) {
    %c0_i32 = arith.constant 0 : i32
    %c0_i32_0 = arith.constant 0 : i32
    return %arg0, %c0_i32 : i32, i32
  }
  func.func @transform_1(%arg0: i32) -> (i32, i32) {
    %c0_i32 = arith.constant 0 : i32
    %c0_i32_0 = arith.constant 0 : i32
    %c0_i32_1 = arith.constant 0 : i32
    return %c0_i32, %c0_i32_0 : i32, i32
  }
  func.func @transform_2(%arg0: i32) -> (i32, i32) {
    %c0_i32 = arith.constant 0 : i32
    %c0_i32_0 = arith.constant 0 : i32
    %c0_i32_1 = arith.constant 0 : i32
    return %c0_i32, %c0_i32_0 : i32, i32
  }
  func.func @transform_3(%arg0: i32) -> (i32, i32) {
    %c0_i32 = arith.constant 0 : i32
    %c0_i32_0 = arith.constant 0 : i32
    %c0_i32_1 = arith.constant 0 : i32
    return %c0_i32, %c0_i32_0 : i32, i32
  }
  func.func @transform_4(%arg0: i32) -> (i32, i32) {
    %c0_i32 = arith.constant 0 : i32
    %c0_i32_0 = arith.constant 0 : i32
    %c0_i32_1 = arith.constant 0 : i32
    return %c0_i32, %c0_i32_0 : i32, i32
  }
  func.func @transform_5(%arg0: i32) -> (i32, i32) {
    %c0_i32 = arith.constant 0 : i32
    %c0_i32_0 = arith.constant 0 : i32
    %c0_i32_1 = arith.constant 0 : i32
    return %c0_i32, %c0_i32_0 : i32, i32
  }
  func.func @transform_6(%arg0: i32) -> (i32, i32) {
    %c0_i32 = arith.constant 0 : i32
    %c0_i32_0 = arith.constant 0 : i32
    %c0_i32_1 = arith.constant 0 : i32
    return %c0_i32, %c0_i32_0 : i32, i32
  }
  func.func @transform_7(%arg0: i32) -> (i32, i32) {
    %c0_i32 = arith.constant 0 : i32
    %c0_i32_0 = arith.constant 0 : i32
    return %c0_i32, %arg0 : i32, i32
  }
}

</mosaic_0001>

<bundles_post_ra>
// kernel: net_forward.1
= control target key start
LH: loop header
LB: loop body
LE: loop exit
PB: predicated region body
PF: predicated region fallthrough
CT: control target
= control target key end

     0   :  { %s841_s0 = inlined_call_operand.vmem [shape: bf16[8,128], index: 0, kind: input, shape index: {}]   ;;  %s842_s1 = inlined_call_operand.vmem [shape: bf16[128,256], index: 1, kind: input, shape index: {}]   ;;  %s843_s2 = inlined_call_operand.vmem [shape: f32[1,256], index: 2, kind: input, shape index: {}]   ;;  %s844_s3 = inlined_call_operand.vmem [shape: bf16[256,256], index: 3, kind: input, shape index: {}]   ;;  %s845_s4 = inlined_call_operand.vmem [shape: f32[1,256], index: 4, kind: input, shape index: {}]   ;;  %s846_s5 = inlined_call_operand.vmem [shape: bf16[1,256], index: 5, kind: input, shape index: {}]   ;;  %s847_s6 = inlined_call_operand.<no memory space> [shape: f32[1,1], index: 6, kind: input, shape index: {}]   ;;  %s848_s7 = inlined_call_operand.hbm [shape: f32[1,8], index: 7, kind: output, shape index: {}]  }
   0x1   :  { %v12_v0 = vstv %s847_s6 }
   0x2   :  { %13 = vst [vmem:[#allocation2] sm:$0x1] %v12_v0 }
   0x3   :  { %v543_v1 = vld [vmem:[%s842_s1 + $0x74] ss:$8 sps:$4 sm:$0xff]   ;;  %v545_v2 = vld [vmem:[%s842_s1 + $0x70] ss:$8 sps:$4 sm:$0xff]   ;;  %v637_v3 = vmov 0  }
   0x4   :  { %171 = vmatprep.mubr.bf16.mxu0 %v637_v3  ;;  %542 = vset.pattern.permute.xlu0 %v637_v3  ;;  %v546_v4 = vld [vmem:[%s842_s1 + $0x64] ss:$8 sps:$4 sm:$0xff]   ;;  %v548_v5 = vld [vmem:[%s842_s1 + $0x60] ss:$8 sps:$4 sm:$0xff]   ;;  %v549_v6 = vld [vmem:[%s842_s1 + $0x54] ss:$8 sps:$4 sm:$0xff]  }
   0x5   :  { %139 = vmatprep.subr.bf16.mxu0 %v543_v1  ;;  %v551_v7 = vld [vmem:[%s842_s1 + $0x50] ss:$8 sps:$4 sm:$0xff]   ;;  %v552_v8 = vld [vmem:[%s842_s1 + $0x44] ss:$8 sps:$4 sm:$0xff]   ;;  %v554_v9 = vld [vmem:[%s842_s1 + $0x40] ss:$8 sps:$4 sm:$0xff]  }
   0x6   :  { %140 = vmatpush1.bf16.msra.mxu0 %v545_v2  ;;  %v555_v10 = vld [vmem:[%s842_s1 + $0x34] ss:$8 sps:$4 sm:$0xff]   ;;  %v569_v12 = vld [vmem:[%s844_s3 + $0x70] ss:$8 sps:$4 sm:$0xff]   ;;  %v570_v13 = vld [vmem:[%s844_s3 + $0x64] ss:$8 sps:$4 sm:$0xff]  }
   0x7   :  { %141 = vmatprep.subr.bf16.mxu0 %v546_v4  ;;  %v567_v11 = vld [vmem:[%s844_s3 + $0x74] ss:$8 sps:$4 sm:$0xff]   ;;  %v557_v14 = vld [vmem:[%s842_s1 + $0x30] ss:$8 sps:$4 sm:$0xff]   ;;  %v572_v15 = vld [vmem:[%s844_s3 + $0x60] ss:$8 sps:$4 sm:$0xff]  }
   0x8   :  { %388 = vmatprep.subr.bf16.mxu1 %v567_v11  ;;  %v573_v16 = vld [vmem:[%s844_s3 + $0x54] ss:$8 sps:$4 sm:$0xff]   ;;  %v558_v17 = vld [vmem:[%s842_s1 + $0x24] ss:$8 sps:$4 sm:$0xff]   ;;  %v560_v18 = vld [vmem:[%s842_s1 + $0x20] ss:$8 sps:$4 sm:$0xff]  }
   0x9   :  { %389 = vmatpush1.bf16.msra.mxu1 %v569_v12  ;;  %v575_v19 = vld [vmem:[%s844_s3 + $0x50] ss:$8 sps:$4 sm:$0xff]   ;;  %v576_v20 = vld [vmem:[%s844_s3 + $0x44] ss:$8 sps:$4 sm:$0xff]   ;;  %v561_v21 = vld [vmem:[%s842_s1 + $0x14] ss:$8 sps:$4 sm:$0xff]  }
   0xa   :  { %142 = vmatpush1.bf16.msra.mxu0 %v548_v5  ;;  %390 = vmatprep.subr.bf16.mxu1 %v570_v13  ;;  %v563_v22 = vld [vmem:[%s842_s1 + $0x10] ss:$8 sps:$4 sm:$0xff]   ;;  %v578_v23 = vld [vmem:[%s844_s3 + $0x40] ss:$8 sps:$4 sm:$0xff]   ;;  %v579_v24 = vld [vmem:[%s844_s3 + $0x34] ss:$8 sps:$4 sm:$0xff]  }
   0xb   :  { %143 = vmatprep.subr.bf16.mxu0 %v549_v6  ;;  %v564_v25 = vld [vmem:[%s842_s1 + $0x4] ss:$8 sps:$4 sm:$0xff]   ;;  %v566_v26 = vld [vmem:[%s842_s1] ss:$8 sps:$4 sm:$0xff]   ;;  %v581_v27 = vld [vmem:[%s844_s3 + $0x30] ss:$8 sps:$4 sm:$0xff]  }
   0xc   :  { %v582_v28 = vld [vmem:[%s844_s3 + $0x24] ss:$8 sps:$4 sm:$0xff]   ;;  %v30_v29 = vld [vmem:[%s841_s0] sm:$0xf]  ;;  %v585_v31 = vld [vmem:[%s844_s3 + $0x14] ss:$8 sps:$4 sm:$0xff]  }
   0xd   :  { %391 = vmatpush1.bf16.msra.mxu1 %v572_v15  ;;  %v584_v30 = vld [vmem:[%s844_s3 + $0x20] ss:$8 sps:$4 sm:$0xff]  }
   0xe   :  { %144 = vmatpush1.bf16.msra.mxu0 %v551_v7  ;;  %392 = vmatprep.subr.bf16.mxu1 %v573_v16 }
   0xf   :  { %145 = vmatprep.subr.bf16.mxu0 %v552_v8 }
  0x11   :  { %393 = vmatpush1.bf16.msra.mxu1 %v575_v19 }
  0x12   :  { %146 = vmatpush1.bf16.msra.mxu0 %v554_v9  ;;  %394 = vmatprep.subr.bf16.mxu1 %v576_v20 }
  0x13   :  { %147 = vmatprep.subr.bf16.mxu0 %v555_v10 }
  0x15   :  { %395 = vmatpush1.bf16.msra.mxu1 %v578_v23 }
  0x16   :  { %148 = vmatpush1.bf16.msra.mxu0 %v557_v14  ;;  %396 = vmatprep.subr.bf16.mxu1 %v579_v24 }
  0x17   :  { %149 = vmatprep.subr.bf16.mxu0 %v558_v17 }
  0x19   :  { %397 = vmatpush1.bf16.msra.mxu1 %v581_v27 }
  0x1a   :  { %150 = vmatpush1.bf16.msra.mxu0 %v560_v18  ;;  %398 = vmatprep.subr.bf16.mxu1 %v582_v28 }
  0x1b   :  { %151 = vmatprep.subr.bf16.mxu0 %v561_v21 }
  0x1e   :  { %152 = vmatpush1.bf16.msra.mxu0 %v563_v22 }
  0x1f   :  { %153 = vmatprep.subr.bf16.mxu0 %v564_v25 }
  0x22   :  { %154 = vmatpush1.bf16.msra.mxu0 %v566_v26 }
  0x23   :  { %14 = vsyncpa [#allocation4], 0  ;;  %399 = vmatpush1.bf16.msra.mxu1 %v584_v30  ;;  %v587_v32 = vld [vmem:[%s844_s3 + $0x10] ss:$8 sps:$4 sm:$0xff]   ;;  %v588_v33 = vld [vmem:[%s844_s3 + $0x4] ss:$8 sps:$4 sm:$0xff]   ;;  %v49_v51 = vlaneseq }
  0x24   :  { %400 = vmatprep.subr.bf16.mxu1 %v585_v31  ;;  %v590_v34 = vld [vmem:[%s844_s3] ss:$8 sps:$4 sm:$0xff]   ;;  %v591_v35 = vld [vmem:[%s844_s3 + $0xf4] ss:$8 sps:$4 sm:$0xff]   ;;  %v593_v36 = vld [vmem:[%s844_s3 + $0xf0] ss:$8 sps:$4 sm:$0xff]  }
  0x25   :  { %172 = vmatmul.mubr.bf16.vlgmr.msra.gmra.mxu0 %v30_v29  ;;  %v594_v37 = vld [vmem:[%s844_s3 + $0xe4] ss:$8 sps:$4 sm:$0xff]   ;;  %v596_v38 = vld [vmem:[%s844_s3 + $0xe0] ss:$8 sps:$4 sm:$0xff]   ;;  %v597_v39 = vld [vmem:[%s844_s3 + $0xd4] ss:$8 sps:$4 sm:$0xff]  }
  0x26   :  { %v599_v40 = vld [vmem:[%s844_s3 + $0xd0] ss:$8 sps:$4 sm:$0xff]   ;;  %v600_v41 = vld [vmem:[%s844_s3 + $0xc4] ss:$8 sps:$4 sm:$0xff]   ;;  %v602_v42 = vld [vmem:[%s844_s3 + $0xc0] ss:$8 sps:$4 sm:$0xff]  }
  0x27   :  { %401 = vmatpush1.bf16.msra.mxu1 %v587_v32  ;;  %v603_v43 = vld [vmem:[%s844_s3 + $0xb4] ss:$8 sps:$4 sm:$0xff]   ;;  %v605_v44 = vld [vmem:[%s844_s3 + $0xb0] ss:$8 sps:$4 sm:$0xff]   ;;  %v606_v45 = vld [vmem:[%s844_s3 + $0xa4] ss:$8 sps:$4 sm:$0xff]  }
  0x28   :  { %402 = vmatprep.subr.bf16.mxu1 %v588_v33  ;;  %v608_v46 = vld [vmem:[%s844_s3 + $0xa0] ss:$8 sps:$4 sm:$0xff]   ;;  %v609_v47 = vld [vmem:[%s844_s3 + $0x94] ss:$8 sps:$4 sm:$0xff]   ;;  %v611_v48 = vld [vmem:[%s844_s3 + $0x90] ss:$8 sps:$4 sm:$0xff]  }
  0x29   :  { %v612_v49 = vld [vmem:[%s844_s3 + $0x84] ss:$8 sps:$4 sm:$0xff]   ;;  %v614_v50 = vld [vmem:[%s844_s3 + $0x80] ss:$8 sps:$4 sm:$0xff]   ;;  %v50_v52 = vshrl.u32 %v49_v51, 7  ;;  %v470_v27 = vand.u32 127, %v49_v51 }
  0x2a   :  { %v47_v54 = vld [vmem:[%s843_s2] sm:$0x3]  ;;  %vm476_vm0 = vcmask 57344  }
  0x2b   :  { %403 = vmatpush1.bf16.msra.mxu1 %v590_v34  ;;  %v51_v53 = vsub.s32 0, %v50_v52  ;;  %v55_v55 = vsub.s32 1, %v50_v52  ;;  %v431_v4 = vld [vmem:[%s846_s5] sm:$0x3]  ;;  %v440_v7 = vsub.s32 2, %v50_v52  ;;  %v473_v30 = vsub.s32 %v470_v27, %v50_v52 }
  0x2c   :  { %404 = vmatprep.subr.bf16.mxu1 %v591_v35  ;;  %v216_v5 = vld [vmem:[%s845_s4] sm:$0x3]  ;;  %v432_v6 = vunpack.c.l.bf16 %v431_v4  ;;  %s638_s4 = smov [#allocation3]  }
  0x2d   :  { %v52_v56 = vrot.slane %v47_v54, %v51_v53  ;;  %v56_v57 = vrot.slane %v47_v54, %v55_v55  ;;  %v221_v8 = vrot.slane %v216_v5, %v51_v53  ;;  %v225_v9 = vrot.slane %v216_v5, %v55_v55  ;;  %v457_v25 = vld [vmem:[#allocation2] sm:$0x1]  ;;  %s484_s5 = sshll.u32 %s638_s4, 4  ;;  %s485_s5 = int_to_ptr.vmem [resolvable:$true] %s484_s5 }
  0x2e   :  { %v437_v10 = vrot.slane %v432_v6, %v51_v53  ;;  %v441_v11 = vrot.slane %v432_v6, %v440_v7  ;;  %s615_s28 = scalar_lea.vmem %s485_s5, 16  ;;  %s619_s29 = scalar_lea.vmem %s485_s5, 32 }
  0x2f   :  { %405 = vmatpush2.bf16.msra.mxu1 %v593_v36  ;;  %p616_p0 = scmp.ne.s32.totalorder %s485_s5, %s615_s28  ;;  %p620_p1 = scmp.lt.s32.totalorder %s485_s5, %s485_s5 }
  0x30   :  { %406 = vmatprep.subr.bf16.mxu1 %v594_v37  ;;  %v447_v17 = vrot.slane %v437_v10, %v51_v53  ;;  %v451_v18 = vrot.slane %v441_v11, %v51_v53  ;;  %p621_p2 = scmp.lt.s32.totalorder %s619_s29, %s615_s28 }
  0x32   :  { %p622_p3 = por %p621_p2, %p620_p1 }
  0x33   :  { %407 = vmatpush2.bf16.msra.mxu1 %v596_v38 }
  0x34   :  { %408 = vmatprep.subr.bf16.mxu1 %v597_v39  ;;  %p623_p4 = pnand %p622_p3, %p616_p0 }
  0x37   :  { %409 = vmatpush2.bf16.msra.mxu1 %v599_v40 }
  0x38   :  { %410 = vmatprep.subr.bf16.mxu1 %v600_v41 }
  0x3b   :  { %411 = vmatpush2.bf16.msra.mxu1 %v602_v42 }
  0x3c   :  { %412 = vmatprep.subr.bf16.mxu1 %v603_v43 }
  0x3f   :  { %413 = vmatpush2.bf16.msra.mxu1 %v605_v44 }
  0x40   :  { %414 = vmatprep.subr.bf16.mxu1 %v606_v45 }
  0x43   :  { %415 = vmatpush2.bf16.msra.mxu1 %v608_v46 }
  0x44   :  { %416 = vmatprep.subr.bf16.mxu1 %v609_v47 }
  0x47   :  { %417 = vmatpush2.bf16.msra.mxu1 %v611_v48 }
  0x48   :  { %418 = vmatprep.subr.bf16.mxu1 %v612_v49 }
  0x4b   :  { %419 = vmatpush2.bf16.msra.mxu1 %v614_v50 }
  0xe5   :  { %v173_v58 = vpop.f32.mrf.mxu0 }
  0xe6   :  { %v174_v59 = vadd.f32 %v173_v58, %v52_v56 }
  0xe7   :  { %v175_v60 = vpop.f32.mrf.mxu0 }
  0xe8   :  { %v176_v61 = vadd.f32 %v175_v60, %v56_v57  ;;  %v180_v62 = vmax.f32 %v174_v59, 0.0 }
  0xe9   :  { %v177_v63 = vpop.f32.mrf.mxu0 }
  0xea   :  { %v181_v0 = vmax.f32 %v176_v61, 0.0  ;;  %v182_v3 = vpack.c.bf16 %v180_v62, %v180_v62 }
  0xeb   :  { %v178_v1 = vpop.f32.mrf.mxu0 }
  0xec   :  { %v183_v2 = vpack.c.bf16 %v181_v0, %v181_v0 }
  0xee   :  { %420 = vmatprep.mubr.bf16.mxu1 %v183_v2 }
  0xef   :  { %421 = vmatmul.mubr.bf16.vlgmr.msra.gmra.mxu1 %v182_v3 }
 0x1af   :  { %v422_v12 = vpop.f32.mrf.mxu1 }
 0x1b0   :  { %v423_v13 = vadd.f32 %v422_v12, %v221_v8 }
 0x1b1   :  { %v424_v14 = vpop.f32.mrf.mxu1 }
 0x1b2   :  { %v429_v15 = vmax.f32 %v423_v13, 0.0  ;;  %v425_v16 = vadd.f32 %v424_v14, %v225_v9 }
 0x1b3   :  { %v426_v19 = vpop.f32.mrf.mxu1 }
 0x1b4   :  { %v430_v20 = vmax.f32 %v425_v16, 0.0  ;;  %v452_v22 = vmul.f32 %v447_v17, %v429_v15 }
 0x1b5   :  { %v427_v21 = vpop.f32.mrf.mxu1 }
 0x1b6   :  { %v453_v23 = vmul.f32 %v451_v18, %v430_v20 }
 0x1b8   :  { %v454_v24 = vadd.f32 %v453_v23, %v452_v22 }
 0x1ba   :  { %455 = vadd.xlane.f32.xlu0 %v454_v24 }
 0x1d0   :  { %460 = vperm.xlu0 %542, %v457_v25  }
 0x243   :  { %v456_v26 = vpop.xlane.xlu0 %455 }
 0x24b   :  { %v461_v28 = vpop.permute.xlu0 %460 }
 0x24c   :  { %v466_v29 = vrot.slane %v461_v28, %v51_v53 }
 0x24e   :  { %v467_v31 = vadd.f32 %v466_v29, %v456_v26 }
 0x250   :  { %v474_v32 = vrot.slane %v467_v31, %v473_v30 }
 0x252   :  { %477 = vst.msk [vmem:[#allocation3] sm:$0x1] %vm476_vm0, %v474_v32 }
 0x253   :  { %626 = shalt.err (!%p623_p4)
}
 0x254   :  { %487 = dma.vmem_to_hbm [thread:$0]  %s485_s5, 16, %s848_s7, [#allocation4]  }
 0x255   :  { %635 = dma.done.wait [#allocation4], 16  }
 0x256   :  { %636 = vsyncadd [#allocation4], 4294967280 }
 0x257   :  { %491 = vsyncpa [#allocation4], 1 }

</bundles_post_ra>
